<compile_context>
chip_gen: v6e
topology: v6e:2x2x1
jax: 0.10.0
libtpu: 0.0.40
codegen_flags: <defaults>
</compile_context>

<pallas_src>
import jax
import jax.numpy as jnp
from jax.experimental import pallas as pl
from jax.experimental.pallas import tpu as pltpu


# ---------------------------------------------------------------------------
# Kernels
# ---------------------------------------------------------------------------

def _decoder_kernel(x_ref, w_ref, b_ref, o_ref):
    # x_ref: (B, nhid)     activation (any float dtype; cast in-kernel)
    # w_ref: (nhid, TN)    weight column tile (matmul dtype, e.g. bf16)
    # b_ref: (1, TN)       bias tile (f32)
    # o_ref: (B, TN)       output tile
    x = x_ref[...].astype(w_ref.dtype)          # in-kernel cast: no extra launch
    h = jnp.dot(x, w_ref[...], preferred_element_type=jnp.float32)
    h = jnp.maximum(h + b_ref[...], 0.0)        # bias + ReLU in f32 (VPU)
    o_ref[...] = jax.nn.sigmoid(h).astype(o_ref.dtype)   # sigmoid rides EUP


def _decoder_kernel_with_y(x_ref, w_ref, b_ref, y_ref, o_ref):
    # Fused y-branch: rows [0:B] <- sigmoid(relu(x@W+b)), rows [B:B+By] <- sigmoid(y).
    B = x_ref.shape[0]
    By = y_ref.shape[0]
    x = x_ref[...].astype(w_ref.dtype)
    h = jnp.dot(x, w_ref[...], preferred_element_type=jnp.float32)
    h = jnp.maximum(h + b_ref[...], 0.0)
    o_ref[pl.ds(0, B), :] = jax.nn.sigmoid(h).astype(o_ref.dtype)
    sy = jax.nn.sigmoid(y_ref[...].astype(jnp.float32))
    o_ref[pl.ds(B, By), :] = sy.astype(o_ref.dtype)


# ---------------------------------------------------------------------------
# Parameter setup (one-time conversion; keeps per-call path cast-free)
# ---------------------------------------------------------------------------

def init_decoder_params(key, nhid, x_dim, *, matmul_dtype=jnp.bfloat16):
    """nn.Linear-style init; returns (w, b) already in kernel-ready layout:
    w: (nhid, x_dim) in matmul_dtype (== torch weight.T), b: (1, x_dim) f32."""
    kw, kb = jax.random.split(key)
    bound = 1.0 / jnp.sqrt(jnp.float32(nhid))
    w = jax.random.uniform(kw, (nhid, x_dim), jnp.float32, -bound, bound)
    b = jax.random.uniform(kb, (x_dim,), jnp.float32, -bound, bound)
    return w.astype(matmul_dtype), b.reshape(1, x_dim).astype(jnp.float32), w, b


# ---------------------------------------------------------------------------
# Forward
# ---------------------------------------------------------------------------

def basic_decoder_forward(x, w, b, y=None, *, tile_n=None, out_dtype=jnp.float32):
    """Pallas implementation of BasicDecoder.forward.

    x: (B, nhid)          activations (f32 or bf16; cast in-kernel)
    w: (nhid, x_dim)      weight, ALREADY in the desired matmul dtype
    b: (1, x_dim) f32     bias, already reshaped (see init_decoder_params)
    y: optional (By, x_dim) -> result is sigmoid(cat(relu(dec1(x)), y), axis=0),
       fused into the same pallas_call.
    tile_n: optional column tile (multiple of 128, must divide x_dim);
       default = whole x_dim, no grid (best for the toy/standalone size).
    out_dtype: output dtype (f32 default for torch parity; bf16 halves writeback).
    """
    B, nhid = x.shape
    nhid_w, x_dim = w.shape
    assert nhid == nhid_w, "weight must be (nhid, x_dim)"
    assert b.shape == (1, x_dim), "bias must be pre-reshaped to (1, x_dim)"

    vmem = pl.BlockSpec(memory_space=pltpu.MemorySpace.VMEM)

    # ------------------------------------------------------------------
    # Default: single step, no grid, whole-array VMEM specs.
    # ------------------------------------------------------------------
    if tile_n is None or tile_n >= x_dim:
        if y is None:
            return pl.pallas_call(
                _decoder_kernel,
                out_shape=jax.ShapeDtypeStruct((B, x_dim), out_dtype),
                in_specs=[vmem, vmem, vmem],
                out_specs=vmem,
            )(x, w, b)
        By = y.shape[0]
        assert y.shape[1] == x_dim
        return pl.pallas_call(
            _decoder_kernel_with_y,
            out_shape=jax.ShapeDtypeStruct((B + By, x_dim), out_dtype),
            in_specs=[vmem, vmem, vmem, vmem],
            out_specs=vmem,
        )(x, w, b, y)

    # ------------------------------------------------------------------
    # Column-tiled path (wide x_dim / v7x 2-TC sharding). Lane-dense tiles only.
    # ------------------------------------------------------------------
    tile_n = max(128, (tile_n // 128) * 128)          # force multiple of 128
    assert x_dim % tile_n == 0, (
        "tile_n must divide x_dim so every output store stays lane-dense")
    grid_n = x_dim // tile_n
    cparams = pltpu.CompilerParams(dimension_semantics=("parallel",))

    if y is None:
        return pl.pallas_call(
            _decoder_kernel,
            out_shape=jax.ShapeDtypeStruct((B, x_dim), out_dtype),
            grid=(grid_n,),
            in_specs=[
                pl.BlockSpec((B, nhid), lambda j: (0, 0)),        # x: whole
                pl.BlockSpec((nhid, tile_n), lambda j: (0, j)),   # W column tile
                pl.BlockSpec((1, tile_n), lambda j: (0, j)),      # bias tile
            ],
            out_specs=pl.BlockSpec((B, tile_n), lambda j: (0, j)),
            compiler_params=cparams,
        )(x, w, b)

    By = y.shape[0]
    assert y.shape[1] == x_dim
    return pl.pallas_call(
        _decoder_kernel_with_y,
        out_shape=jax.ShapeDtypeStruct((B + By, x_dim), out_dtype),
        grid=(grid_n,),
        in_specs=[
            pl.BlockSpec((B, nhid), lambda j: (0, 0)),
            pl.BlockSpec((nhid, tile_n), lambda j: (0, j)),
            pl.BlockSpec((1, tile_n), lambda j: (0, j)),
            pl.BlockSpec((By, tile_n), lambda j: (0, j)),         # y column tile
        ],
        out_specs=pl.BlockSpec((B + By, tile_n), lambda j: (0, j)),
        compiler_params=cparams,
    )(x, w, b, y)


# ---------------------------------------------------------------------------
# Self-test
# ---------------------------------------------------------------------------

if __name__ == "__main__":
    key = jax.random.PRNGKey(0)
    k_x, k_y, k_p = jax.random.split(key, 3)

    B, nhid, x_dim = 8, 16, 512   # module defaults: nhid=16, x_dim=512
    x = jax.random.normal(k_x, (B, nhid), jnp.float32)

    # One-time parameter conversion (bf16 weight for the MXU, f32 (1,x_dim) bias).
    w_bf16, b2, w_f32, b_f32 = init_decoder_params(k_p, nhid, x_dim)
    b2_f32 = b_f32.reshape(1, x_dim)

    # Pure-JAX f32 reference.
    ref = jax.nn.sigmoid(jnp.maximum(x @ w_f32 + b_f32, 0.0))

    # Default (bf16 matmul, no grid) path.
    out = jax.block_until_ready(basic_decoder_forward(x, w_bf16, b2))
    assert out.shape == (B, x_dim)
    assert jnp.allclose(out, ref, atol=1e-2, rtol=1e-2)

    # Full-f32 path for a tight check of the kernel math itself.
    out_f32 = jax.block_until_ready(basic_decoder_forward(x, w_f32, b2_f32))
    assert jnp.allclose(out_f32, ref, atol=1e-5, rtol=1e-5)

    # y-branch, fused into a single pallas_call.
    By = 4
    y = jax.random.normal(k_y, (By, x_dim), jnp.float32)
    out_y = jax.block_until_ready(basic_decoder_forward(x, w_bf16, b2, y=y))
    ref_y = jax.nn.sigmoid(
        jnp.concatenate([jnp.maximum(x @ w_f32 + b_f32, 0.0), y], axis=0))
    assert out_y.shape == (B + By, x_dim)
    assert jnp.allclose(out_y, ref_y, atol=1e-2, rtol=1e-2)

    # Exercise the column-tiled path (lane-dense 128-wide tiles) with y fused.
    out_t = jax.block_until_ready(
        basic_decoder_forward(x, w_bf16, b2, y=y, tile_n=128))
    assert out_t.shape == (B + By, x_dim)
    assert jnp.allclose(out_t, ref_y, atol=1e-2, rtol=1e-2)

    print("KERNEL_OK")
</pallas_src>

<mosaic_0001>
module attributes {stable_mosaic.version = 11 : i64} {
  func.func @_decoder_kernel(%arg0: memref<8x16xf32, #tpu.memory_space<vmem>>, %arg1: memref<16x512xbf16, #tpu.memory_space<vmem>>, %arg2: memref<1x512xf32, #tpu.memory_space<vmem>>, %arg3: memref<8x512xf32, #tpu.memory_space<vmem>>) attributes {dimension_semantics = [], scalar_prefetch = 0 : i64, scratch_operands = 0 : i64, tpu.core_type = #tpu.core_type<tc>} {
    %c0 = arith.constant 0 : index
    %c0_0 = arith.constant 0 : index
    %0 = vector.load %arg0[%c0, %c0_0] : memref<8x16xf32, #tpu.memory_space<vmem>>, vector<8x16xf32>
    %1 = arith.truncf %0 : vector<8x16xf32> to vector<8x16xbf16>
    %c0_1 = arith.constant 0 : index
    %c0_2 = arith.constant 0 : index
    %2 = vector.load %arg1[%c0_1, %c0_2] : memref<16x512xbf16, #tpu.memory_space<vmem>>, vector<16x512xbf16>
    %cst = arith.constant dense<0.000000e+00> : vector<8x512xf32>
    %3 = tpu.matmul %1, %2, %cst {dimension_numbers = #tpu.dot_dimension_numbers<[1], [0], [0], [1], [0, 0, 1, 1], [], []>} : vector<8x16xbf16>, vector<16x512xbf16>, vector<8x512xf32> -> vector<8x512xf32>
    %c0_3 = arith.constant 0 : index
    %c0_4 = arith.constant 0 : index
    %4 = vector.load %arg2[%c0_3, %c0_4] : memref<1x512xf32, #tpu.memory_space<vmem>>, vector<1x512xf32>
    %5 = vector.broadcast %4 : vector<1x512xf32> to vector<8x512xf32>
    %6 = arith.addf %3, %5 : vector<8x512xf32>
    %cst_5 = arith.constant 0.000000e+00 : f32
    %7 = vector.broadcast %cst_5 : f32 to vector<8x512xf32>
    %8 = arith.maximumf %6, %7 : vector<8x512xf32>
    %9 = arith.negf %8 : vector<8x512xf32>
    %10 = math.exp %9 : vector<8x512xf32>
    %cst_6 = arith.constant 1.000000e+00 : f32
    %11 = vector.broadcast %cst_6 : f32 to vector<8x512xf32>
    %12 = arith.addf %11, %10 : vector<8x512xf32>
    %13 = arith.divf %11, %12 : vector<8x512xf32>
    %c0_7 = arith.constant 0 : index
    %c0_8 = arith.constant 0 : index
    %14 = vector.load %arg3[%c0_7, %c0_8] : memref<8x512xf32, #tpu.memory_space<vmem>>, vector<8x512xf32>
    tpu.vector_store %arg3[%c0_7, %c0_8], %13 {strides = array<i32>} : memref<8x512xf32, #tpu.memory_space<vmem>>, vector<8x512xf32>,
    return
  }
}

</mosaic_0001>

<bundles_post_ra>
// kernel: tpu_custom_call.1
= control target key start
LH: loop header
LB: loop body
LE: loop exit
PB: predicated region body
PF: predicated region fallthrough
CT: control target
= control target key end

     0   :  { %8 = vsyncpa [#allocation3], 0  ;;  %s399_s0 = inlined_call_operand.hbm [shape: f32[8,16], index: 0, kind: input, shape index: {}]   ;;  %s400_s1 = inlined_call_operand.hbm [shape: bf16[16,512], index: 1, kind: input, shape index: {}]   ;;  %s401_s2 = inlined_call_operand.hbm [shape: f32[1,512], index: 2, kind: input, shape index: {}]   ;;  %s402_s3 = inlined_call_operand.hbm [shape: f32[8,512], index: 3, kind: output, shape index: {}]  }
   0x1   :  { %9 = vsyncpa [#allocation6], 0 }
   0x2   :  { %10 = vsyncpa [#allocation4], 0  ;;  %s360_s12 = smov [#allocation5]  }
   0x3   :  { %s26_s13 = sshll.u32 %s360_s12, 4  ;;  %s27_s13 = int_to_ptr.vmem [resolvable:$true] %s26_s13 }
   0x4   :  { %s282_s14 = scalar_lea.vmem %s27_s13, 512  ;;  %p287_p1 = scmp.lt.s32.totalorder %s27_s13, %s27_s13 }
   0x5   :  { %p283_p0 = scmp.ne.s32.totalorder %s27_s13, %s282_s14  ;;  %p288_p2 = scmp.lt.s32.totalorder %s282_s14, %s282_s14 }
   0x7   :  { %p289_p3 = por %p288_p2, %p287_p1 }
   0x9   :  { %p290_p4 = pnand %p289_p3, %p283_p0 }
   0xb   :  { %293 = shalt.err (!%p290_p4)
}
   0xc   :  { %s361_s15 = smov 256   ;;  %s362_s16 = smov 16  }
   0xd   :  { %32 = dma.hbm_to_vmem [thread:$0]  %s400_s1, 512, %s27_s13, [#allocation6], %s361_s15, %s361_s15, %s362_s16  }
   0xe   :  { %s363_s19 = smov [#allocation2]   ;;  %s364_s21 = smov [#allocation7]  }
   0xf   :  { %s17_s20 = sshll.u32 %s363_s19, 4  ;;  %s39_s22 = sshll.u32 %s364_s21, 4  ;;  %s18_s20 = int_to_ptr.vmem [resolvable:$true] %s17_s20  ;;  %s40_s22 = int_to_ptr.vmem [resolvable:$true] %s39_s22 }
  0x10   :  { %s302_s23 = scalar_lea.vmem %s18_s20, 128  ;;  %p307_p6 = scmp.lt.s32.totalorder %s18_s20, %s18_s20 }
  0x11   :  { %p303_p5 = scmp.ne.s32.totalorder %s18_s20, %s302_s23  ;;  %p308_p7 = scmp.lt.s32.totalorder %s302_s23, %s302_s23 }
  0x13   :  { %p309_p8 = por %p308_p7, %p307_p6 }
  0x15   :  { %p310_p9 = pnand %p309_p8, %p303_p5 }
  0x17   :  { %313 = shalt.err (!%p310_p9)
}
  0x18   :  { %20 = dma.hbm_to_vmem [thread:$0]  %s399_s0, 128, %s18_s20, [#allocation3]  }
  0x19   :  { %s322_s26 = scalar_lea.vmem %s40_s22, 64  ;;  %p327_p11 = scmp.lt.s32.totalorder %s40_s22, %s40_s22 }
  0x1a   :  { %p323_p10 = scmp.ne.s32.totalorder %s40_s22, %s322_s26  ;;  %p328_p12 = scmp.lt.s32.totalorder %s322_s26, %s322_s26 }
  0x1c   :  { %p329_p13 = por %p328_p12, %p327_p11 }
  0x1e   :  { %p330_p0 = pnand %p329_p13, %p323_p10 }
  0x20   :  { %333 = shalt.err (!%p330_p0)
}
  0x21   :  { %42 = dma.hbm_to_vmem [thread:$0]  %s401_s2, 64, %s40_s22, [#allocation6]  }
  0x22   :  { %354 = dma.done.wait [#allocation3], 128  }
  0x23   :  { %355 = vsyncadd [#allocation3], 4294967168 }
  0x24   :  { %356 = dma.done.wait [#allocation6], 576  }
  0x25   :  { %357 = vsyncadd [#allocation6], 4294966720  ;;  %v365_v0 = vmov 0   ;;  %v252_v1 = vld [vmem:[#allocation5 + $0x4] ss:$16 sps:$4 sm:$0xff]   ;;  %v53_v5 = vld [vmem:[#allocation2] sm:$0xff]  ;;  %v61_v7 = vlaneseq }
  0x26   :  { %137 = vmatprep.mubr.bf16.mxu0 %v365_v0  ;;  %178 = vmatprep.mubr.bf16.mxu1 %v365_v0  ;;  %v254_v2 = vld [vmem:[#allocation5 + $0xc] ss:$16 sps:$4 sm:$0xff]   ;;  %v256_v3 = vld [vmem:[#allocation5] ss:$16 sps:$4 sm:$0xff]   ;;  %v257_v4 = vld [vmem:[#allocation5 + $0x8] ss:$16 sps:$4 sm:$0xff]   ;;  %v54_v6 = vpack.c.bf16 %v53_v5, %v53_v5 }
  0x27   :  { %119 = vmatprep.subr.bf16.mxu0 %v252_v1  ;;  %160 = vmatprep.subr.bf16.mxu1 %v254_v2  ;;  %vm101_vm0 = vcmask 130048   ;;  %v62_v8 = vshrl.u32 %v61_v7, 7  ;;  %v59_v11 = vld [vmem:[#allocation7] sm:$0xf]  ;;  %s366_s0 = smov [#allocation8]  }
  0x28   :  { %120 = vmatpush1.bf16.msra.mxu0 %v256_v3  ;;  %161 = vmatpush1.bf16.msra.mxu1 %v257_v4  ;;  %s225_s2 = sshll.u32 %s366_s0, 4  ;;  %s226_s2 = int_to_ptr.vmem [resolvable:$true] %s225_s2 }
  0x29   :  { %v63_v9 = vsub.s32 0, %v62_v8  ;;  %v71_v10 = vsub.s32 2, %v62_v8  ;;  %v67_v12 = vsub.s32 1, %v62_v8  ;;  %v75_v13 = vsub.s32 3, %v62_v8  ;;  %s334_s28 = scalar_lea.vmem %s226_s2, 512  ;;  %p339_p2 = scmp.lt.s32.totalorder %s226_s2, %s226_s2 }
  0x2a   :  { %p335_p1 = scmp.ne.s32.totalorder %s226_s2, %s334_s28  ;;  %p340_p3 = scmp.lt.s32.totalorder %s334_s28, %s334_s28 }
  0x2b   :  { %239 = vmatmul.mubr.msk.bf16.vlgmr.msra.gmra.mxu0 %vm101_vm0, %v54_v6  ;;  %240 = vmatmul.mubr.msk.bf16.vlgmr.msra.gmra.mxu1 %vm101_vm0, %v54_v6  ;;  %v64_v14 = vrot.slane %v59_v11, %v63_v9  ;;  %v72_v15 = vrot.slane %v59_v11, %v71_v10  ;;  %v68_v16 = vrot.slane %v59_v11, %v67_v12 }
  0x2c   :  { %v76_v17 = vrot.slane %v59_v11, %v75_v13  ;;  %p341_p4 = por %p340_p3, %p339_p2 }
  0x2e   :  { %p342_p5 = pnand %p341_p4, %p335_p1 }
  0xeb   :  { %v139_v18 = vpop.f32.mrf.mxu0  ;;  %v180_v19 = vpop.f32.mrf.mxu1 }
  0xec   :  { %v140_v20 = vadd.f32 %v139_v18, %v64_v14  ;;  %v181_v21 = vadd.f32 %v180_v19, %v72_v15 }
  0xed   :  { %v141_v22 = vpop.f32.mrf.mxu0  ;;  %v182_v23 = vpop.f32.mrf.mxu1 }
  0xee   :  { %v187_v24 = vmax.f32 %v140_v20, 0.0  ;;  %v189_v25 = vmax.f32 %v181_v21, 0.0  ;;  %v142_v26 = vadd.f32 %v141_v22, %v68_v16  ;;  %v183_v27 = vadd.f32 %v182_v23, %v76_v17 }
  0xef   :  { %v143_v28 = vpop.f32.mrf.mxu0  ;;  %v184_v29 = vpop.f32.mrf.mxu1 }
  0xf0   :  { %v241_v30 = vmul.f32 -1.442695, %v187_v24  ;;  %v243_v31 = vmul.f32 -1.442695, %v189_v25  ;;  %v188_v32 = vmax.f32 %v142_v26, 0.0  ;;  %v190_v33 = vmax.f32 %v183_v27, 0.0 }
  0xf1   :  { %v144_v34 = vpop.f32.mrf.mxu0  ;;  %v185_v35 = vpop.f32.mrf.mxu1 }
  0xf2   :  { %258 = vpow2.f32 %v241_v30  ;;  %v242_v36 = vmul.f32 -1.442695, %v188_v32  ;;  %v244_v37 = vmul.f32 -1.442695, %v190_v33 }
  0xf3   :  { %260 = vpow2.f32 %v243_v31 }
  0xf4   :  { %262 = vpow2.f32 %v242_v36 }
  0xf5   :  { %264 = vpow2.f32 %v244_v37 }
  0xff   :  { %v259_v38 = vpop.eup %258 }
 0x100   :  { %v261_v39 = vpop.eup %260  ;;  %v203_v40 = vadd.f32 1.0, %v259_v38 }
 0x101   :  { %v263_v41 = vpop.eup %262  ;;  %v205_v42 = vadd.f32 1.0, %v261_v39 }
 0x102   :  { %v265_v43 = vpop.eup %264  ;;  %266 = vrcp.f32 %v203_v40  ;;  %v204_v44 = vadd.f32 1.0, %v263_v41 }
 0x103   :  { %268 = vrcp.f32 %v205_v42  ;;  %v206_v45 = vadd.f32 1.0, %v265_v43 }
 0x104   :  { %270 = vrcp.f32 %v204_v44 }
 0x105   :  { %272 = vrcp.f32 %v206_v45 }
 0x10f   :  { %v267_v46 = vpop.eup %266 }
 0x110   :  { %v269_v47 = vpop.eup %268  ;;  %215 = vst [vmem:[#allocation8] sm:$0xff] %v267_v46 }
 0x111   :  { %v271_v48 = vpop.eup %270  ;;  %217 = vst [vmem:[#allocation8 + $0x10] sm:$0xff] %v269_v47 }
 0x112   :  { %v273_v49 = vpop.eup %272  ;;  %216 = vst [vmem:[#allocation8 + $0x8] sm:$0xff] %v271_v48 }
 0x113   :  { %218 = vst [vmem:[#allocation8 + $0x18] sm:$0xff] %v273_v49 }
 0x114   :  { %345 = shalt.err (!%p342_p5)
}
 0x115   :  { %228 = dma.vmem_to_hbm [thread:$0]  %s226_s2, 512, %s402_s3, [#allocation4]  }
 0x116   :  { %358 = dma.done.wait [#allocation4], 512  }
 0x117   :  { %359 = vsyncadd [#allocation4], 4294966784 }
 0x118   :  { %232 = vsyncpa [#allocation3], 1 }
 0x119   :  { %233 = vsyncpa [#allocation6], 1 }
 0x11a   :  { %234 = vsyncpa [#allocation4], 1 }

</bundles_post_ra>
